<compile_context>
chip_gen: v7x
topology: tpu7x:2x2x1
jax: 0.10.0
libtpu: 0.0.40
codegen_flags: <defaults>
</compile_context>

<pallas_src>
import jax
import jax.numpy as jnp
from jax.experimental import pallas as pl
from jax.experimental.pallas import tpu as pltpu


def _round_up(x, m):
    return ((x + m - 1) // m) * m


def _layer_dims(n_struct, n_hps):
    # (out_features, in_features) per layer, PyTorch module order.
    return ((10, n_struct), (10, 10), (6, n_hps), (8, 16), (8, 8), (1, 8))


def pack_params(params, n_struct, n_hps):
    """Pack all weights/biases into one small f32 slab.

    Each layer occupies rows [off, off+out) with `off` sublane-aligned;
    columns [0, in) hold the PyTorch-layout [out, in] weight and column `in`
    holds the bias.  Returns (slab, row_offsets).
    """
    dims = _layer_dims(n_struct, n_hps)
    ws = params[0::2]
    bs = params[1::2]
    offs, off = [], 0
    for out_f, _ in dims:
        offs.append(off)
        off = _round_up(off + out_f, 8)
    n_rows = _round_up(off, 8)
    n_cols = _round_up(max(in_f for _, in_f in dims) + 1, 8)
    slab = jnp.zeros((n_rows, n_cols), jnp.float32)
    for (out_f, in_f), o, w, b in zip(dims, offs, ws, bs):
        slab = slab.at[o:o + out_f, :in_f].set(w.astype(jnp.float32))
        slab = slab.at[o:o + out_f, in_f].set(b.astype(jnp.float32))
    return slab, tuple(offs)


def _make_kernel(n_struct, n_hps, offs):
    o1, o2, o3, o4, o5, o6 = offs
    f32 = jnp.float32

    def kernel(x_ref, w_ref, out_ref):
        # Streamed activations: batch on lanes, features on sublanes.
        xs = x_ref[0:n_struct, :].astype(f32)                       # [n_struct, TM]
        xh = x_ref[n_struct:n_struct + n_hps, :].astype(f32)        # [n_hps,    TM]

        # ---- struct branch --------------------------------------------------
        h = jnp.dot(w_ref[o1:o1 + 10, 0:n_struct], xs, preferred_element_type=f32)
        h = jnp.maximum(h + w_ref[o1:o1 + 10, n_struct:n_struct + 1], 0.0)
        h = jnp.dot(w_ref[o2:o2 + 10, 0:10], h, preferred_element_type=f32)
        h_struct = jnp.maximum(h + w_ref[o2:o2 + 10, 10:11], 0.0)            # [10, TM]

        # ---- hps branch -----------------------------------------------------
        g = jnp.dot(w_ref[o3:o3 + 6, 0:n_hps], xh, preferred_element_type=f32)
        h_hps = jnp.maximum(g + w_ref[o3:o3 + 6, n_hps:n_hps + 1], 0.0)      # [6, TM]

        # ---- integrate: W @ concat == W[:, :10] @ h_s + W[:, 10:] @ h_h ------
        z = (jnp.dot(w_ref[o4:o4 + 8, 0:10], h_struct, preferred_element_type=f32)
             + jnp.dot(w_ref[o4:o4 + 8, 10:16], h_hps, preferred_element_type=f32)
             + w_ref[o4:o4 + 8, 16:17])
        z = jnp.maximum(z, 0.0)                                              # [8, TM]

        # ---- final layers ----------------------------------------------------
        z = jnp.dot(w_ref[o5:o5 + 8, 0:8], z, preferred_element_type=f32)
        z = jnp.maximum(z + w_ref[o5:o5 + 8, 8:9], 0.0)
        r = (jnp.dot(w_ref[o6:o6 + 1, 0:8], z, preferred_element_type=f32)
             + w_ref[o6:o6 + 1, 8:9])                                        # [1, TM]

        # Exact sigmoid (exp -> EUP; divide is only [1, TM]).
        out_ref[...] = (1.0 / (1.0 + jnp.exp(-r))).astype(out_ref.dtype)

    return kernel


def twig_large_forward(X_struct, X_hps, params, *, tm=16 * 1024,
                       stream_dtype=jnp.float32):
    """Fused TWIG_Large forward. X_struct [B, n_struct], X_hps [B, n_hps] -> [B, 1]."""
    B, n_struct = X_struct.shape
    n_hps = X_hps.shape[1]
    n_feat = n_struct + n_hps

    # ---- batch tiling --------------------------------------------------------
    b128 = _round_up(B, 128)
    TM = min(_round_up(tm, 128), b128)
    # Keep the grid long enough (>= 8 steps) for megacore sharding (v7x) and
    # pipeline double-buffering, but never shrink the tile below ~4K lanes so
    # the per-step fixed overhead stays amortised.
    if b128 // TM < 8:
        TM = min(TM, max(_round_up(pl.cdiv(b128, 8), 128), 4096))
        TM = min(TM, b128)
    B_pad = _round_up(b128, TM)
    grid = (B_pad // TM,)

    # ---- operands ------------------------------------------------------------
    # One fused cast+concat+pad+transpose producing the lane-dense
    # [n_feat, B_pad] slab the kernel streams (single extra HBM copy under jit).
    x = jnp.concatenate([X_struct.astype(stream_dtype),
                         X_hps.astype(stream_dtype)], axis=1)        # [B, n_feat]
    x_t = jnp.pad(x, ((0, B_pad - B), (0, 0))).T                     # [n_feat, B_pad]

    w_slab, offs = pack_params(params, n_struct, n_hps)
    kernel = _make_kernel(n_struct, n_hps, offs)

    # ---- VMEM budget: double-buffered streams + f32 intermediates (+ margin) --
    est = (2 * (n_feat + 1) + 64) * TM * 4
    vmem_limit = int(min(56 << 20, max(32 << 20, 2 * est)))

    out = pl.pallas_call(
        kernel,
        out_shape=jax.ShapeDtypeStruct((1, B_pad), jnp.float32),
        grid=grid,
        in_specs=[
            pl.BlockSpec((n_feat, TM), lambda i: (0, i)),      # streamed activations
            pl.BlockSpec(w_slab.shape, lambda i: (0, 0)),      # resident weight slab
        ],
        out_specs=pl.BlockSpec((1, TM), lambda i: (0, i)),
        compiler_params=pltpu.CompilerParams(
            dimension_semantics=("parallel",),
            vmem_limit_bytes=vmem_limit,
        ),
    )(x_t, w_slab)

    return out[:, :B].T            # [B, 1], matching the PyTorch module


def init_params(key, n_struct, n_hps):
    """Deterministic init. Weights stored PyTorch-style: [out_features, in_features]."""
    params = []
    for i, (fan_out, fan_in) in enumerate(_layer_dims(n_struct, n_hps)):
        kw, kb = jax.random.split(jax.random.fold_in(key, i))
        bound = 1.0 / jnp.sqrt(fan_in)
        w = jax.random.uniform(kw, (fan_out, fan_in), jnp.float32, -bound, bound)
        b = jax.random.uniform(kb, (fan_out,), jnp.float32, -bound, bound)
        params.extend([w, b])
    return tuple(params)


def reference_forward(X_struct, X_hps, params):
    """Plain-JAX reference mirroring the PyTorch forward exactly."""
    (w_s1, b_s1, w_s2, b_s2, w_h1, b_h1,
     w_int, b_int, w_f1, b_f1, w_f2, b_f2) = params
    xs = jnp.maximum(X_struct @ w_s1.T + b_s1, 0.0)
    xs = jnp.maximum(xs @ w_s2.T + b_s2, 0.0)
    xh = jnp.maximum(X_hps @ w_h1.T + b_h1, 0.0)
    x = jnp.concatenate([xs, xh], axis=1)
    x = jnp.maximum(x @ w_int.T + b_int, 0.0)
    x = jnp.maximum(x @ w_f1.T + b_f1, 0.0)
    r = x @ w_f2.T + b_f2
    return jax.nn.sigmoid(r)


if __name__ == "__main__":
    n_struct, n_hps, batch = 23, 9, 8

    key = jax.random.PRNGKey(0)
    k_xs, k_xh, k_p = jax.random.split(key, 3)
    X_struct = jax.random.normal(k_xs, (batch, n_struct), jnp.float32)
    X_hps = jax.random.normal(k_xh, (batch, n_hps), jnp.float32)
    params = init_params(k_p, n_struct, n_hps)

    # jit the wrapper so input prep (cast+concat+pad+transpose) fuses into a
    # single copy around the pallas_call.
    fwd = jax.jit(lambda a, b: twig_large_forward(a, b, params))
    out = jax.block_until_ready(fwd(X_struct, X_hps))
    ref = reference_forward(X_struct, X_hps, params)

    assert out.shape == (batch, 1), out.shape
    assert jnp.allclose(out, ref, atol=1e-5, rtol=1e-5), (out, ref)

    print("KERNEL_OK")
</pallas_src>

<mosaic_0001>
module attributes {stable_mosaic.version = 11 : i64} {
  func.func @kernel(%arg0: i32, %arg1: memref<32x128xf32, #tpu.memory_space<vmem>>, %arg2: memref<64x24xf32, #tpu.memory_space<vmem>>, %arg3: memref<1x128xf32, #tpu.memory_space<vmem>>) attributes {dimension_semantics = [#tpu.dimension_semantics<parallel>], iteration_bounds = array<i64: 1>, scalar_prefetch = 0 : i64, scratch_operands = 0 : i64, tpu.core_type = #tpu.core_type<tc>, window_params = [{transform_indices = @transform_0, window_bounds = array<i64: 32, 128>}, {pipeline_mode = #tpu.pipeline_mode<synchronous>, transform_indices = @transform_1, window_bounds = array<i64: 64, 24>}, {transform_indices = @transform_2, window_bounds = array<i64: 1, 128>}]} {
    %c0 = arith.constant 0 : index
    %c0_0 = arith.constant 0 : index
    %0 = vector.load %arg1[%c0, %c0_0] : memref<32x128xf32, #tpu.memory_space<vmem>>, vector<23x128xf32>
    %c23 = arith.constant 23 : index
    %c0_1 = arith.constant 0 : index
    %1 = vector.load %arg1[%c23, %c0_1] : memref<32x128xf32, #tpu.memory_space<vmem>>, vector<9x128xf32>
    %c0_2 = arith.constant 0 : index
    %c0_3 = arith.constant 0 : index
    %2 = vector.load %arg2[%c0_2, %c0_3] : memref<64x24xf32, #tpu.memory_space<vmem>>, vector<10x23xf32>
    %cst = arith.constant dense<0.000000e+00> : vector<10x128xf32>
    %3 = tpu.matmul %2, %0, %cst {dimension_numbers = #tpu.dot_dimension_numbers<[1], [0], [0], [1], [0, 0, 1, 1], [], []>} : vector<10x23xf32>, vector<23x128xf32>, vector<10x128xf32> -> vector<10x128xf32>
    %c0_4 = arith.constant 0 : index
    %c23_5 = arith.constant 23 : index
    %4 = vector.load %arg2[%c0_4, %c23_5] : memref<64x24xf32, #tpu.memory_space<vmem>>, vector<10x1xf32>
    %5 = vector.broadcast %4 : vector<10x1xf32> to vector<10x128xf32>
    %6 = arith.addf %3, %5 : vector<10x128xf32>
    %cst_6 = arith.constant 0.000000e+00 : f32
    %7 = vector.broadcast %cst_6 : f32 to vector<10x128xf32>
    %8 = arith.maximumf %6, %7 : vector<10x128xf32>
    %c16 = arith.constant 16 : index
    %c0_7 = arith.constant 0 : index
    %9 = vector.load %arg2[%c16, %c0_7] : memref<64x24xf32, #tpu.memory_space<vmem>>, vector<10x10xf32>
    %cst_8 = arith.constant dense<0.000000e+00> : vector<10x128xf32>
    %10 = tpu.matmul %9, %8, %cst_8 {dimension_numbers = #tpu.dot_dimension_numbers<[1], [0], [0], [1], [0, 0, 1, 1], [], []>} : vector<10x10xf32>, vector<10x128xf32>, vector<10x128xf32> -> vector<10x128xf32>
    %c16_9 = arith.constant 16 : index
    %c10 = arith.constant 10 : index
    %11 = vector.load %arg2[%c16_9, %c10] : memref<64x24xf32, #tpu.memory_space<vmem>>, vector<10x1xf32>
    %12 = vector.broadcast %11 : vector<10x1xf32> to vector<10x128xf32>
    %13 = arith.addf %10, %12 : vector<10x128xf32>
    %cst_10 = arith.constant 0.000000e+00 : f32
    %14 = vector.broadcast %cst_10 : f32 to vector<10x128xf32>
    %15 = arith.maximumf %13, %14 : vector<10x128xf32>
    %c32 = arith.constant 32 : index
    %c0_11 = arith.constant 0 : index
    %16 = vector.load %arg2[%c32, %c0_11] : memref<64x24xf32, #tpu.memory_space<vmem>>, vector<6x9xf32>
    %cst_12 = arith.constant dense<0.000000e+00> : vector<6x128xf32>
    %17 = tpu.matmul %16, %1, %cst_12 {dimension_numbers = #tpu.dot_dimension_numbers<[1], [0], [0], [1], [0, 0, 1, 1], [], []>} : vector<6x9xf32>, vector<9x128xf32>, vector<6x128xf32> -> vector<6x128xf32>
    %c32_13 = arith.constant 32 : index
    %c9 = arith.constant 9 : index
    %18 = vector.load %arg2[%c32_13, %c9] : memref<64x24xf32, #tpu.memory_space<vmem>>, vector<6x1xf32>
    %19 = vector.broadcast %18 : vector<6x1xf32> to vector<6x128xf32>
    %20 = arith.addf %17, %19 : vector<6x128xf32>
    %cst_14 = arith.constant 0.000000e+00 : f32
    %21 = vector.broadcast %cst_14 : f32 to vector<6x128xf32>
    %22 = arith.maximumf %20, %21 : vector<6x128xf32>
    %c40 = arith.constant 40 : index
    %c0_15 = arith.constant 0 : index
    %23 = vector.load %arg2[%c40, %c0_15] : memref<64x24xf32, #tpu.memory_space<vmem>>, vector<8x10xf32>
    %cst_16 = arith.constant dense<0.000000e+00> : vector<8x128xf32>
    %24 = tpu.matmul %23, %15, %cst_16 {dimension_numbers = #tpu.dot_dimension_numbers<[1], [0], [0], [1], [0, 0, 1, 1], [], []>} : vector<8x10xf32>, vector<10x128xf32>, vector<8x128xf32> -> vector<8x128xf32>
    %c40_17 = arith.constant 40 : index
    %c10_18 = arith.constant 10 : index
    %25 = vector.load %arg2[%c40_17, %c10_18] : memref<64x24xf32, #tpu.memory_space<vmem>>, vector<8x6xf32>
    %cst_19 = arith.constant dense<0.000000e+00> : vector<8x128xf32>
    %26 = tpu.matmul %25, %22, %cst_19 {dimension_numbers = #tpu.dot_dimension_numbers<[1], [0], [0], [1], [0, 0, 1, 1], [], []>} : vector<8x6xf32>, vector<6x128xf32>, vector<8x128xf32> -> vector<8x128xf32>
    %27 = arith.addf %24, %26 : vector<8x128xf32>
    %c40_20 = arith.constant 40 : index
    %c16_21 = arith.constant 16 : index
    %28 = vector.load %arg2[%c40_20, %c16_21] : memref<64x24xf32, #tpu.memory_space<vmem>>, vector<8x1xf32>
    %29 = vector.broadcast %28 : vector<8x1xf32> to vector<8x128xf32>
    %30 = arith.addf %27, %29 : vector<8x128xf32>
    %cst_22 = arith.constant 0.000000e+00 : f32
    %31 = vector.broadcast %cst_22 : f32 to vector<8x128xf32>
    %32 = arith.maximumf %30, %31 : vector<8x128xf32>
    %c48 = arith.constant 48 : index
    %c0_23 = arith.constant 0 : index
    %33 = vector.load %arg2[%c48, %c0_23] : memref<64x24xf32, #tpu.memory_space<vmem>>, vector<8x8xf32>
    %cst_24 = arith.constant dense<0.000000e+00> : vector<8x128xf32>
    %34 = tpu.matmul %33, %32, %cst_24 {dimension_numbers = #tpu.dot_dimension_numbers<[1], [0], [0], [1], [0, 0, 1, 1], [], []>} : vector<8x8xf32>, vector<8x128xf32>, vector<8x128xf32> -> vector<8x128xf32>
    %c48_25 = arith.constant 48 : index
    %c8 = arith.constant 8 : index
    %35 = vector.load %arg2[%c48_25, %c8] : memref<64x24xf32, #tpu.memory_space<vmem>>, vector<8x1xf32>
    %36 = vector.broadcast %35 : vector<8x1xf32> to vector<8x128xf32>
    %37 = arith.addf %34, %36 : vector<8x128xf32>
    %cst_26 = arith.constant 0.000000e+00 : f32
    %38 = vector.broadcast %cst_26 : f32 to vector<8x128xf32>
    %39 = arith.maximumf %37, %38 : vector<8x128xf32>
    %c56 = arith.constant 56 : index
    %c0_27 = arith.constant 0 : index
    %40 = vector.load %arg2[%c56, %c0_27] : memref<64x24xf32, #tpu.memory_space<vmem>>, vector<1x8xf32>
    %cst_28 = arith.constant dense<0.000000e+00> : vector<1x128xf32>
    %41 = tpu.matmul %40, %39, %cst_28 {dimension_numbers = #tpu.dot_dimension_numbers<[1], [0], [0], [1], [0, 0, 1, 1], [], []>} : vector<1x8xf32>, vector<8x128xf32>, vector<1x128xf32> -> vector<1x128xf32>
    %c56_29 = arith.constant 56 : index
    %c8_30 = arith.constant 8 : index
    %42 = vector.load %arg2[%c56_29, %c8_30] : memref<64x24xf32, #tpu.memory_space<vmem>>, vector<1x1xf32>
    %43 = vector.broadcast %42 : vector<1x1xf32> to vector<1x128xf32>
    %44 = arith.addf %41, %43 : vector<1x128xf32>
    %cst_31 = arith.constant 0.000000e+00 : f32
    %45 = vector.broadcast %cst_31 : f32 to vector<1x128xf32>
    %46 = arith.subf %45, %44 : vector<1x128xf32>
    %47 = math.exp %46 : vector<1x128xf32>
    %cst_32 = arith.constant 1.000000e+00 : f32
    %48 = vector.broadcast %cst_32 : f32 to vector<1x128xf32>
    %49 = arith.addf %48, %47 : vector<1x128xf32>
    %cst_33 = arith.constant 1.000000e+00 : f32
    %50 = vector.broadcast %cst_33 : f32 to vector<1x128xf32>
    %51 = arith.divf %50, %49 : vector<1x128xf32>
    %c0_34 = arith.constant 0 : index
    %c0_35 = arith.constant 0 : index
    %52 = vector.load %arg3[%c0_34, %c0_35] : memref<1x128xf32, #tpu.memory_space<vmem>>, vector<1x128xf32>
    tpu.vector_store %arg3[%c0_34, %c0_35], %51 {strides = array<i32>} : memref<1x128xf32, #tpu.memory_space<vmem>>, vector<1x128xf32>,
    return
  }
  func.func @transform_0(%arg0: i32) -> (i32, i32) {
    %c0_i32 = arith.constant 0 : i32
    %c0_i32_0 = arith.constant 0 : i32
    return %c0_i32, %arg0 : i32, i32
  }
  func.func @transform_1(%arg0: i32) -> (i32, i32) {
    %c0_i32 = arith.constant 0 : i32
    %c0_i32_0 = arith.constant 0 : i32
    %c0_i32_1 = arith.constant 0 : i32
    return %c0_i32, %c0_i32_0 : i32, i32
  }
  func.func @transform_2(%arg0: i32) -> (i32, i32) {
    %c0_i32 = arith.constant 0 : i32
    %c0_i32_0 = arith.constant 0 : i32
    return %c0_i32, %arg0 : i32, i32
  }
}

</mosaic_0001>

<bundles_post_ra>
// kernel: _lambda_.1
= control target key start
LH: loop header
LB: loop body
LE: loop exit
PB: predicated region body
PF: predicated region fallthrough
CT: control target
= control target key end

     0   :  { %vm28_vm0 = vcmask 187392   ;;  %v745_v2 = vmov 23   ;;  %vm33_vm1 = vcmask 1046528   ;;  %vm126_vm2 = vcmask 80896   ;;  %s750_s27 = smov 118   ;;  %s840_s0 = inlined_call_operand.vmem [shape: f32[32,128], index: 0, kind: input, shape index: {}]   ;;  %s841_s1 = inlined_call_operand.vmem [shape: f32[64,24], index: 1, kind: input, shape index: {}]   ;;  %s842_s2 = inlined_call_operand.vmem [shape: f32[1,128], index: 2, kind: output, shape index: {}]  }
   0x1   :  { %v11_v0 = vld [vmem:[%s840_s0] sm:$0xff]  ;;  %v12_v1 = vld [vmem:[%s840_s0 + $0x8] sm:$0xff]  ;;  %735 = vset.pattern.permute.xlu0 %v745_v2  ;;  %v13_v5 = vld [vmem:[%s840_s0 + $0x10] sm:$0x7f]  ;;  %v746_v8 = vmov 0.0   ;;  %vm747_vm3 = vmmov 0  }
   0x2   :  { %v707_v3 = vpack.c.bf16 %v12_v1, %v11_v0  ;;  %v16_v4 = vld [vmem:[%s841_s1] sm:$0xff]  ;;  %v17_v6 = vld [vmem:[%s841_s1 + $0x8] sm:$0x3]  ;;  %v114_v7 = vld [vmem:[%s841_s1 + $0x10] sm:$0xff]  ;;  %v748_v10 = vmov 10   ;;  %v749_v11 = vmov 9  }
   0x3   :  { %668 = vmatprep.mubr.msk.f32.mxu0 %vm28_vm0, %v16_v4  ;;  %20 = vperm.xlu0 %735, %v16_v4   ;;  %v212_v9 = vld [vmem:[%s841_s1 + $0x20] sm:$0x3f]  ;;  %v115_v12 = vld [vmem:[%s841_s1 + $0x18] sm:$0x3]  ;;  %v296_v13 = vld [vmem:[%s841_s1 + $0x28] sm:$0xff]  ;;  %vm131_vm4 = vcmask 1041408  }
   0x4   :  { %708 = vmatprep.subr.bf16.mxu0 %v707_v3  ;;  %675 = vmatprep.mubr.msk.f32.mxu1 %vm126_vm2, %v114_v7  ;;  %vm751_vm5 = vmmov 1   ;;  %v14_v24 = vld [vmem:[%s840_s0 + $0x17] sm:$0xff]  ;;  %v15_v25 = vld [vmem:[%s840_s0 + $0x1f] sm:$0x1]  ;;  %vm221_vm7 = vcmask 1040384   ;;  %v752_v27 = vmov 0.0|0.0  }
   0x5   :  { %710 = vmatpush3.bf16.msra.mxu0 %v707_v3  ;;  %736 = vset.pattern.permute.xlu1 %v748_v10  ;;  %vm803_vm6 = vmpackc.low %vm131_vm4, %vm751_vm5  ;;  %v718_v26 = vpack.c.bf16 %v15_v25, %v14_v24  ;;  %vm218_vm9 = vcmask 72704   ;;  %v753_v28 = vmov 16   ;;  %vm303_vm10 = vcmask 1045504   ;;  %v458_v44 = vld [vmem:[%s841_s1 + $0x30] sm:$0xff]  ;;  %v538_v54 = vld [vmem:[%s841_s1 + $0x38] sm:$0x1] }
   0x6   :  { %666 = vmatprep.subr.msk.mxu0 %vm33_vm1, %v13_v5  ;;  %118 = vperm.xlu1 %736, %v114_v7   ;;  %vm719_vm8 = vmpackc.low %vm221_vm7, %vm751_vm5  ;;  %vm300_vm11 = vcmask 48128   ;;  %v754_v45 = vmov 8   ;;  %vm464_vm12 = vcmask 64512  }
   0x7   :  { %25 = vperm.xlu0 %735, %v17_v6  }
   0x9   :  { %667 = vmatpush3.msk.msra.mxu0 %vm33_vm1, %v13_v5 }
   0xa   :  { %669 = vmatmul.mubr.msk.f32.vlgmr.msra.gmra.mrb[0].mxu0 %vm28_vm0, %v17_v6  ;;  %685 = vmatprep.subr.mxu0 %v746_v8 }
   0xb   :  { %687 = vmatprep.mubr.msk.f32.mxu0 %vm747_vm3, %v746_v8  ;;  %737 = vset.pattern.permute.xlu0 %v749_v11 }
   0xc   :  { %215 = vperm.xlu0 %737, %v212_v9   ;;  %123 = vperm.xlu1 %736, %v115_v12  }
  0x10   :  { %298 = vrot.lane.b32.xlu1 %v296_v13, %s750_s27  ;;  %739 = vset.pattern.permute.xlu0 %v754_v45 }
  0x11   :  { %738 = vset.pattern.permute.xlu1 %v753_v28  ;;  %461 = vperm.xlu0 %739, %v458_v44  }
  0x14   :  { %453 = vperm.xlu1 %738, %v296_v13  }
  0x18   :  { %740 = vset.pattern.permute.xlu1 %v754_v45 }
  0x19   :  { %541 = vperm.xlu1 %740, %v538_v54  }
  0x82   :  { %v21_v14 = vpop.permute.xlu0 %20 }
  0x85   :  { %v119_v29 = vpop.permute.xlu1 %118 }
  0x86   :  { %v26_v15 = vpop.permute.xlu0 %25 }
  0x8b   :  { %v124_v30 = vpop.permute.xlu1 %123  ;;  %v216_v35 = vpop.permute.xlu0 %215 }
  0x8f   :  { %v299_v43 = vpop.permute.xlu1 %298 }
  0x90   :  { %v462_v55 = vpop.permute.xlu0 %461 }
  0x93   :  { %v454_v47 = vpop.permute.xlu1 %453 }
  0x98   :  { %v542_v60 = vpop.permute.xlu1 %541 }
  0xdd   :  { %v670_v16 = vpop.f32.mrb[0].mxu0 }
  0xde   :  { %v109_v17 = vadd.f32 %v670_v16, %v26_v15  ;;  %v103_v18 = vpop.f32.mrb[1].mxu0 }
  0xdf   :  { %v104_v19 = vadd.f32 %v103_v18, %v21_v14 }
  0xe0   :  { %v113_v20 = vmax.f32 %v109_v17, 0.0 }
  0xe1   :  { %v112_v21 = vmax.f32 %v104_v19, 0.0 }
  0xe3   :  { %v711_v23 = vpack.c.bf16 %v113_v20, %v112_v21 }
  0xe5   :  { %713 = vmatprep.subr.msk.bf16.mxu1 %vm803_vm6, %v711_v23 }
  0xe6   :  { %716 = vmatpush3.bf16.msk.msra.mxu1 %vm803_vm6, %v711_v23 }
  0xe7   :  { %717 = vmatprep.subr.bf16.mxu1 %v752_v27 }
  0xe9   :  { %676 = vmatmul.mubr.msk.f32.vlgmr.msra.gmra.mrb[0].mxu1 %vm126_vm2, %v115_v12 }
  0xea   :  { %720 = vmatpush3.bf16.msk.msra.mxu1 %vm719_vm8, %v718_v26  ;;  %682 = vmatprep.mubr.msk.f32.mxu1 %vm747_vm3, %v746_v8 }
  0xeb   :  { %721 = vmatprep.subr.bf16.mxu1 %v752_v27 }
  0xed   :  { %683 = vmatmul.mubr.msk.f32.vlgmr.msra.gmra.mrb[2].mxu1 %vm218_vm9, %v212_v9 }
  0xee   :  { %694 = vmatprep.mubr.msk.f32.mxu1 %vm747_vm3, %v746_v8 }
 0x1bc   :  { %v677_v31 = vpop.f32.mrb[0].mxu1 }
 0x1bd   :  { %v207_v32 = vadd.f32 %v677_v31, %v124_v30  ;;  %v201_v33 = vpop.f32.mrb[1].mxu1 }
 0x1be   :  { %v202_v34 = vadd.f32 %v201_v33, %v119_v29 }
 0x1bf   :  { %v211_v36 = vmax.f32 %v207_v32, 0.0 }
 0x1c0   :  { %v210_v37 = vmax.f32 %v202_v34, 0.0  ;;  %v291_v38 = vpop.f32.mrb[2].mxu1 }
 0x1c1   :  { %v292_v39 = vadd.f32 %v291_v38, %v216_v35  ;;  %v684_v40 = vpop.f32.mrb[3].mxu1 }
 0x1c2   :  { %v722_v41 = vpack.c.bf16 %v211_v36, %v210_v37 }
 0x1c3   :  { %v295_v42 = vmax.f32 %v292_v39, 0.0 }
 0x1c4   :  { %724 = vmatpush3.bf16.msk.msra.mxu1 %vm803_vm6, %v722_v41 }
 0x1c5   :  { %686 = vmatpush3.msk.msra.mxu0 %vm303_vm10, %v295_v42  ;;  %702 = vmatprep.subr.mxu1 %v746_v8 }
 0x1c6   :  { %688 = vmatmul.mubr.msk.f32.vlgmr.msra.gmra.mrb[2].mxu0 %vm300_vm11, %v299_v43  ;;  %697 = vmatprep.subr.mxu0 %v746_v8 }
 0x1c7   :  { %695 = vmatmul.mubr.msk.f32.vlgmr.msra.gmra.mrb[4].mxu1 %vm126_vm2, %v296_v13  ;;  %699 = vmatprep.mubr.msk.f32.mxu0 %vm747_vm3, %v746_v8 }
 0x1c8   :  { %704 = vmatprep.mubr.msk.f32.mxu1 %vm747_vm3, %v746_v8 }
 0x299   :  { %v373_v46 = vpop.f32.mrb[2].mxu0 }
 0x29a   :  { %v689_v48 = vpop.f32.mrb[3].mxu0  ;;  %v448_v49 = vpop.f32.mrb[4].mxu1 }
 0x29b   :  { %v449_v50 = vadd.f32 %v448_v49, %v373_v46  ;;  %v696_v51 = vpop.f32.mrb[5].mxu1 }
 0x29d   :  { %v456_v52 = vadd.f32 %v454_v47, %v449_v50 }
 0x29f   :  { %v457_v53 = vmax.f32 %v456_v52, 0.0 }
 0x2a1   :  { %698 = vmatpush3.msra.mxu0 %v457_v53 }
 0x2a2   :  { %700 = vmatmul.mubr.msk.f32.vlgmr.msra.gmra.mrb[4].mxu0 %vm464_vm12, %v458_v44 }
 0x375   :  { %v533_v56 = vpop.f32.mrb[4].mxu0 }
 0x376   :  { %v534_v57 = vadd.f32 %v533_v56, %v462_v55  ;;  %v701_v58 = vpop.f32.mrb[5].mxu0 }
 0x378   :  { %v537_v59 = vmax.f32 %v534_v57, 0.0 }
 0x37a   :  { %703 = vmatpush3.msra.mxu1 %v537_v59 }
 0x37b   :  { %705 = vmatmul.mubr.msk.f32.vlgmr.msra.gmra.mrb[6].mxu1 %vm464_vm12, %v538_v54 }
 0x44e   :  { %v612_v61 = vpop.f32.mrb[6].mxu1 }
 0x44f   :  { %v613_v62 = vadd.f32 %v612_v61, %v542_v60  ;;  %v706_v63 = vpop.f32.mrb[7].mxu1 }
 0x451   :  { %v616_v0 = vsub.f32 0.0, %v613_v62 }
 0x453   :  { %v617_v1 = vmul.f32 1.442695, %v616_v0 }
 0x455   :  { %741 = vpow2.f32 %v617_v1 }
 0x45f   :  { %v742_v2 = vpop.eup %741 }
 0x460   :  { %v619_v3 = vadd.f32 1.0, %v742_v2 }
 0x462   :  { %743 = vrcp.f32 %v619_v3 }
 0x46c   :  { %v744_v4 = vpop.eup %743 }
 0x46d   :  { %622 = vst [vmem:[%s842_s2] sm:$0x1] %v744_v4 }

</bundles_post_ra>
